<compile_context>
chip_gen: v6e
topology: v6e:2x2x1
jax: 0.10.0
libtpu: 0.0.40
codegen_flags: <defaults>
</compile_context>

<pallas_src>
import functools

import jax
import jax.numpy as jnp
from jax.experimental import pallas as pl
from jax.experimental.pallas import tpu as pltpu


def _round_up(x, m):
    return ((x + m - 1) // m) * m


def decoder_rnn_kernel(x_ref, h_ref, w_cat_ref, b_ref, w_out_ref, b_out_ref,
                       pred_ref, h_out_ref, cat_ref, *, n_layers, lanes):
    """One decode step of an n_layers tanh-RNN + output projection.

    x_ref:     (TILE_B, E)          input features (any float dtype)
    h_ref:     (L, TILE_B, H)       previous hidden state
    w_cat_ref: (L, 2P, P)    bf16   fused [[W_ih],[W_hh]], stored (in, out), padded
    b_ref:     (L, 1, P)     f32    fused bias (b_ih + b_hh), padded
    w_out_ref: (P, E)        bf16   fc_out weight, stored (in, out)
    b_out_ref: (1, E)        f32    fc_out bias
    pred_ref:  (TILE_B, E)   f32    prediction output
    h_out_ref: (L, TILE_B, H) bf16  new hidden state output
    cat_ref:   (TILE_B, 2P)  bf16   VMEM staging buffer for the fused-K operand
    """
    P = lanes
    E = x_ref.shape[-1]
    H = h_ref.shape[-1]

    # Zero the staging buffer so padded lanes are exactly 0; they stay 0 through
    # every layer because the padded weight rows/columns and bias lanes are 0.
    cat_ref[...] = jnp.zeros_like(cat_ref)
    # Input dropout == identity in eval mode.
    cat_ref[:, :E] = x_ref[...].astype(cat_ref.dtype)

    for l in range(n_layers):                        # static; n_layers is small
        cat_ref[:, P:P + H] = h_ref[l].astype(cat_ref.dtype)
        # One fused K=2P MXU pass:  [x_l | h_l] @ [[W_ih],[W_hh]]
        g = jnp.dot(cat_ref[...], w_cat_ref[l],
                    preferred_element_type=jnp.float32)
        h_new = jnp.tanh(g + b_ref[l])               # f32 VPU/EUP (v5e-safe)
        h_out_ref[l] = h_new[:, :H].astype(h_out_ref.dtype)
        # Inter-layer dropout == identity in eval mode; feed the next layer.
        cat_ref[:, :P] = h_new.astype(cat_ref.dtype)

    pred = jnp.dot(cat_ref[:, :P], w_out_ref[...],
                   preferred_element_type=jnp.float32)
    pred_ref[...] = (pred + b_out_ref[...]).astype(pred_ref.dtype)


def _choose_tiling(B, tile_b):
    """Pick (TILE_B, Bp, n_tiles): TILE_B a multiple of 16 (bf16 sublane
    packing); >=2 tiles when the batch allows it (v7x has 2 TensorCores)."""
    n_tiles = max(1, pl.cdiv(B, tile_b))
    if n_tiles < 2 and B >= 32:
        n_tiles = 2
    if n_tiles == 1:
        return B, B, 1                 # block dim == array dim: always legal
    tile = _round_up(pl.cdiv(B, n_tiles), 16)
    n_tiles = pl.cdiv(B, tile)
    return tile, tile * n_tiles, n_tiles


def decoder_rnn_forward(x, hidden, params, *, tile_b=512):
    """One decoder step (eval mode).

    x:      (B, output_dim) float   (the `input` arg of the PyTorch forward)
    hidden: (n_layers, B, hid_dim) float
    Returns (prediction (B, output_dim) f32,
             new_hidden (n_layers, B, hid_dim) bf16).
    """
    w_cat, b = params["w_cat"], params["b"]
    w_out, b_out = params["w_out"], params["b_out"]
    L, _, P = w_cat.shape
    B, E = x.shape
    H = hidden.shape[-1]

    TILE_B, Bp, n_tiles = _choose_tiling(B, tile_b)
    if Bp != B:                        # batch-only pad (no feature padding)
        x = jnp.pad(x, ((0, Bp - B), (0, 0)))
        hidden = jnp.pad(hidden, ((0, 0), (0, Bp - B), (0, 0)))

    # Roofline hints for the XLA scheduler.
    flops = 2 * Bp * P * (2 * P * L + E)
    bytes_accessed = (x.size * x.dtype.itemsize
                      + hidden.size * hidden.dtype.itemsize
                      + w_cat.size * 2 + b.size * 4
                      + w_out.size * 2 + b_out.size * 4
                      + Bp * E * 4 + L * Bp * H * 2)

    # Explicit scoped-VMEM budget: resident weights, double-buffered activation
    # tiles/outputs, plus the fused-K staging scratch (with headroom).
    weight_bytes = w_cat.size * 2 + b.size * 4 + w_out.size * 2 + b_out.size * 4
    act_bytes = (TILE_B * E * x.dtype.itemsize
                 + L * TILE_B * H * hidden.dtype.itemsize
                 + TILE_B * E * 4 + L * TILE_B * H * 2)
    scratch_bytes = TILE_B * 2 * P * 2
    vmem_needed = 2 * weight_bytes + 2 * act_bytes + scratch_bytes
    vmem_limit = int(min(64 * 1024 * 1024,          # v7x physical VMEM per TC
                         max(16 * 1024 * 1024, 2 * vmem_needed)))

    kernel = functools.partial(decoder_rnn_kernel, n_layers=L, lanes=P)

    pred, h_new = pl.pallas_call(
        kernel,
        out_shape=(jax.ShapeDtypeStruct((Bp, E), jnp.float32),
                   jax.ShapeDtypeStruct((L, Bp, H), jnp.bfloat16)),
        grid=(n_tiles,),
        in_specs=[
            pl.BlockSpec((TILE_B, E), lambda i: (i, 0)),        # x batch tile
            pl.BlockSpec((L, TILE_B, H), lambda i: (0, i, 0)),  # hidden batch tile
            pl.BlockSpec((L, 2 * P, P), lambda i: (0, 0, 0)),   # resident weights
            pl.BlockSpec((L, 1, P), lambda i: (0, 0, 0)),
            pl.BlockSpec((P, E), lambda i: (0, 0)),
            pl.BlockSpec((1, E), lambda i: (0, 0)),
        ],
        out_specs=(
            pl.BlockSpec((TILE_B, E), lambda i: (i, 0)),
            pl.BlockSpec((L, TILE_B, H), lambda i: (0, i, 0)),
        ),
        scratch_shapes=[pltpu.VMEM((TILE_B, 2 * P), jnp.bfloat16)],
        compiler_params=pltpu.CompilerParams(
            dimension_semantics=("parallel",),
            vmem_limit_bytes=vmem_limit),
        cost_estimate=pl.CostEstimate(
            flops=flops, transcendentals=L * Bp * P,
            bytes_accessed=bytes_accessed),
    )(x, hidden, w_cat, b, w_out, b_out)

    if Bp != B:
        pred, h_new = pred[:B], h_new[:, :B]
    return pred, h_new


def init_params(key, output_dim, hid_dim, n_layers):
    """PyTorch-style init (uniform +/- 1/sqrt(hid_dim)).

    Per-layer W_ih and W_hh are stored transposed as (in, out), stacked along
    the K axis into w_cat[l] of shape (2P, P), zero-padded to
    P = round_up(max(output_dim, hid_dim), 128) and cast to bf16 for the MXU.
    b_ih and b_hh are fused (they are always added together); biases stay f32.
    fc_out is stored as (P, output_dim) so the prediction output is unpadded.
    """
    P = _round_up(max(output_dim, hid_dim), 128)
    bound = 1.0 / float(jnp.sqrt(jnp.float32(hid_dim)))
    ks = iter(jax.random.split(key, 4 * n_layers + 2))

    w_cat = jnp.zeros((n_layers, 2 * P, P), jnp.float32)
    b = jnp.zeros((n_layers, 1, P), jnp.float32)
    for l in range(n_layers):
        in_dim = output_dim if l == 0 else hid_dim
        wi = jax.random.uniform(next(ks), (in_dim, hid_dim), jnp.float32, -bound, bound)
        wh = jax.random.uniform(next(ks), (hid_dim, hid_dim), jnp.float32, -bound, bound)
        bi = jax.random.uniform(next(ks), (hid_dim,), jnp.float32, -bound, bound)
        bh = jax.random.uniform(next(ks), (hid_dim,), jnp.float32, -bound, bound)
        w_cat = w_cat.at[l, :in_dim, :hid_dim].set(wi)
        w_cat = w_cat.at[l, P:P + hid_dim, :hid_dim].set(wh)
        b = b.at[l, 0, :hid_dim].set(bi + bh)

    wo = jax.random.uniform(next(ks), (hid_dim, output_dim), jnp.float32, -bound, bound)
    bo = jax.random.uniform(next(ks), (output_dim,), jnp.float32, -bound, bound)
    w_out = jnp.zeros((P, output_dim), jnp.float32).at[:hid_dim, :].set(wo)
    b_out = bo.reshape(1, output_dim)

    return {
        "w_cat": w_cat.astype(jnp.bfloat16),
        "b": b,
        "w_out": w_out.astype(jnp.bfloat16),
        "b_out": b_out,
    }


def reference_forward(x, hidden, params):
    """Pure-JAX reference mirroring the kernel numerics (bf16-rounded operands,
    f32 accumulation/elementwise), eval-mode dropout (identity)."""
    L, _, P = params["w_cat"].shape
    w_cat = params["w_cat"].astype(jnp.float32)
    w_out = params["w_out"].astype(jnp.float32)
    b, b_out = params["b"], params["b_out"]
    B, E = x.shape
    H = hidden.shape[-1]

    cur = jnp.zeros((B, P), jnp.float32).at[:, :E].set(
        x.astype(jnp.bfloat16).astype(jnp.float32))
    new_h = []
    for l in range(L):
        h_l = jnp.zeros((B, P), jnp.float32).at[:, :H].set(
            hidden[l].astype(jnp.bfloat16).astype(jnp.float32))
        cat = jnp.concatenate([cur, h_l], axis=-1)
        hn = jnp.tanh(cat @ w_cat[l] + b[l])
        new_h.append(hn[:, :H])
        cur = hn.astype(jnp.bfloat16).astype(jnp.float32)
    pred = cur @ w_out + b_out
    return pred, jnp.stack(new_h)


if __name__ == "__main__":
    key = jax.random.PRNGKey(0)
    k_x, k_h, k_p = jax.random.split(key, 3)

    output_dim = 32
    hid_dim = 64
    n_layers = 2
    batch = 8

    x = jax.random.normal(k_x, (batch, output_dim), jnp.float32)
    hidden = jax.random.normal(k_h, (n_layers, batch, hid_dim), jnp.float32)
    params = init_params(k_p, output_dim, hid_dim, n_layers)

    pred, new_hidden = decoder_rnn_forward(x, hidden, params)
    pred, new_hidden = jax.block_until_ready((pred, new_hidden))

    ref_pred, ref_hidden = reference_forward(x, hidden, params)
    assert pred.shape == (batch, output_dim)
    assert new_hidden.shape == (n_layers, batch, hid_dim)
    assert jnp.allclose(pred, ref_pred, atol=2e-2, rtol=2e-2), "prediction mismatch"
    assert jnp.allclose(new_hidden.astype(jnp.float32), ref_hidden,
                        atol=2e-2, rtol=2e-2), "hidden mismatch"

    print("KERNEL_OK")
</pallas_src>

<mosaic_0001>
module attributes {stable_mosaic.version = 11 : i64} {
  func.func @decoder_rnn_kernel(%arg0: i32, %arg1: memref<8x32xf32, #tpu.memory_space<vmem>>, %arg2: memref<2x8x64xf32, #tpu.memory_space<vmem>>, %arg3: memref<2x256x128xbf16, #tpu.memory_space<vmem>>, %arg4: memref<2x1x128xf32, #tpu.memory_space<vmem>>, %arg5: memref<128x32xbf16, #tpu.memory_space<vmem>>, %arg6: memref<1x32xf32, #tpu.memory_space<vmem>>, %arg7: memref<8x32xf32, #tpu.memory_space<vmem>>, %arg8: memref<2x8x64xbf16, #tpu.memory_space<vmem>>, %arg9: memref<8x256xbf16, #tpu.memory_space<vmem>>) attributes {dimension_semantics = [#tpu.dimension_semantics<parallel>], iteration_bounds = array<i64: 1>, scalar_prefetch = 0 : i64, scratch_operands = 1 : i64, tpu.core_type = #tpu.core_type<tc>, window_params = [{transform_indices = @transform_0, window_bounds = array<i64: 8, 32>}, {transform_indices = @transform_1, window_bounds = array<i64: 2, 8, 64>}, {pipeline_mode = #tpu.pipeline_mode<synchronous>, transform_indices = @transform_2, window_bounds = array<i64: 2, 256, 128>}, {pipeline_mode = #tpu.pipeline_mode<synchronous>, transform_indices = @transform_3, window_bounds = array<i64: 2, 1, 128>}, {pipeline_mode = #tpu.pipeline_mode<synchronous>, transform_indices = @transform_4, window_bounds = array<i64: 128, 32>}, {pipeline_mode = #tpu.pipeline_mode<synchronous>, transform_indices = @transform_5, window_bounds = array<i64: 1, 32>}, {transform_indices = @transform_6, window_bounds = array<i64: 8, 32>}, {transform_indices = @transform_7, window_bounds = array<i64: 2, 8, 64>}]} {
    %cst = arith.constant 0.000000e+00 : bf16
    %0 = vector.broadcast %cst : bf16 to vector<8x256xbf16>
    %c0 = arith.constant 0 : index
    %c0_0 = arith.constant 0 : index
    %1 = vector.load %arg9[%c0, %c0_0] : memref<8x256xbf16, #tpu.memory_space<vmem>>, vector<8x256xbf16>
    tpu.vector_store %arg9[%c0, %c0_0], %0 {strides = array<i32>} : memref<8x256xbf16, #tpu.memory_space<vmem>>, vector<8x256xbf16>,
    %c0_1 = arith.constant 0 : index
    %c0_2 = arith.constant 0 : index
    %2 = vector.load %arg1[%c0_1, %c0_2] : memref<8x32xf32, #tpu.memory_space<vmem>>, vector<8x32xf32>
    %3 = arith.truncf %2 : vector<8x32xf32> to vector<8x32xbf16>
    %c0_3 = arith.constant 0 : index
    %c0_4 = arith.constant 0 : index
    %4 = vector.load %arg9[%c0_3, %c0_4] : memref<8x256xbf16, #tpu.memory_space<vmem>>, vector<8x32xbf16>
    tpu.vector_store %arg9[%c0_3, %c0_4], %3 {strides = array<i32>} : memref<8x256xbf16, #tpu.memory_space<vmem>>, vector<8x32xbf16>,
    %c0_5 = arith.constant 0 : index
    %c0_6 = arith.constant 0 : index
    %c0_7 = arith.constant 0 : index
    %5 = vector.load %arg2[%c0_5, %c0_6, %c0_7] : memref<2x8x64xf32, #tpu.memory_space<vmem>>, vector<1x8x64xf32>
    %6 = vector.shape_cast %5 : vector<1x8x64xf32> to vector<8x64xf32>
    %7 = arith.truncf %6 : vector<8x64xf32> to vector<8x64xbf16>
    %c0_8 = arith.constant 0 : index
    %c128 = arith.constant 128 : index
    %8 = vector.load %arg9[%c0_8, %c128] : memref<8x256xbf16, #tpu.memory_space<vmem>>, vector<8x64xbf16>
    tpu.vector_store %arg9[%c0_8, %c128], %7 {strides = array<i32>} : memref<8x256xbf16, #tpu.memory_space<vmem>>, vector<8x64xbf16>,
    %c0_9 = arith.constant 0 : index
    %c0_10 = arith.constant 0 : index
    %9 = vector.load %arg9[%c0_9, %c0_10] : memref<8x256xbf16, #tpu.memory_space<vmem>>, vector<8x256xbf16>
    %c0_11 = arith.constant 0 : index
    %c0_12 = arith.constant 0 : index
    %c0_13 = arith.constant 0 : index
    %10 = vector.load %arg3[%c0_11, %c0_12, %c0_13] : memref<2x256x128xbf16, #tpu.memory_space<vmem>>, vector<1x256x128xbf16>
    %11 = vector.shape_cast %10 : vector<1x256x128xbf16> to vector<256x128xbf16>
    %cst_14 = arith.constant dense<0.000000e+00> : vector<8x128xf32>
    %12 = tpu.matmul %9, %11, %cst_14 {dimension_numbers = #tpu.dot_dimension_numbers<[1], [0], [0], [1], [0, 0, 1, 1], [], []>} : vector<8x256xbf16>, vector<256x128xbf16>, vector<8x128xf32> -> vector<8x128xf32>
    %c0_15 = arith.constant 0 : index
    %c0_16 = arith.constant 0 : index
    %c0_17 = arith.constant 0 : index
    %13 = vector.load %arg4[%c0_15, %c0_16, %c0_17] : memref<2x1x128xf32, #tpu.memory_space<vmem>>, vector<1x1x128xf32>
    %14 = vector.shape_cast %13 : vector<1x1x128xf32> to vector<1x128xf32>
    %15 = vector.broadcast %14 : vector<1x128xf32> to vector<8x128xf32>
    %16 = arith.addf %12, %15 : vector<8x128xf32>
    %17 = math.tanh %16 : vector<8x128xf32>
    %18 = vector.extract_strided_slice %17 {offsets = [0, 0], sizes = [8, 64], strides = [1, 1]} : vector<8x128xf32> to vector<8x64xf32>
    %19 = arith.truncf %18 : vector<8x64xf32> to vector<8x64xbf16>
    %c0_18 = arith.constant 0 : index
    %c0_19 = arith.constant 0 : index
    %c0_20 = arith.constant 0 : index
    %20 = vector.load %arg8[%c0_18, %c0_19, %c0_20] : memref<2x8x64xbf16, #tpu.memory_space<vmem>>, vector<1x8x64xbf16>
    %21 = vector.shape_cast %20 : vector<1x8x64xbf16> to vector<8x64xbf16>
    %22 = vector.shape_cast %19 : vector<8x64xbf16> to vector<1x8x64xbf16>
    tpu.vector_store %arg8[%c0_18, %c0_19, %c0_20], %22 {strides = array<i32>} : memref<2x8x64xbf16, #tpu.memory_space<vmem>>, vector<1x8x64xbf16>,
    %23 = arith.truncf %17 : vector<8x128xf32> to vector<8x128xbf16>
    %c0_21 = arith.constant 0 : index
    %c0_22 = arith.constant 0 : index
    %24 = vector.load %arg9[%c0_21, %c0_22] : memref<8x256xbf16, #tpu.memory_space<vmem>>, vector<8x128xbf16>
    tpu.vector_store %arg9[%c0_21, %c0_22], %23 {strides = array<i32>} : memref<8x256xbf16, #tpu.memory_space<vmem>>, vector<8x128xbf16>,
    %c1 = arith.constant 1 : index
    %c0_23 = arith.constant 0 : index
    %c0_24 = arith.constant 0 : index
    %25 = vector.load %arg2[%c1, %c0_23, %c0_24] : memref<2x8x64xf32, #tpu.memory_space<vmem>>, vector<1x8x64xf32>
    %26 = vector.shape_cast %25 : vector<1x8x64xf32> to vector<8x64xf32>
    %27 = arith.truncf %26 : vector<8x64xf32> to vector<8x64xbf16>
    %c0_25 = arith.constant 0 : index
    %c128_26 = arith.constant 128 : index
    %28 = vector.load %arg9[%c0_25, %c128_26] : memref<8x256xbf16, #tpu.memory_space<vmem>>, vector<8x64xbf16>
    tpu.vector_store %arg9[%c0_25, %c128_26], %27 {strides = array<i32>} : memref<8x256xbf16, #tpu.memory_space<vmem>>, vector<8x64xbf16>,
    %c0_27 = arith.constant 0 : index
    %c0_28 = arith.constant 0 : index
    %29 = vector.load %arg9[%c0_27, %c0_28] : memref<8x256xbf16, #tpu.memory_space<vmem>>, vector<8x256xbf16>
    %c1_29 = arith.constant 1 : index
    %c0_30 = arith.constant 0 : index
    %c0_31 = arith.constant 0 : index
    %30 = vector.load %arg3[%c1_29, %c0_30, %c0_31] : memref<2x256x128xbf16, #tpu.memory_space<vmem>>, vector<1x256x128xbf16>
    %31 = vector.shape_cast %30 : vector<1x256x128xbf16> to vector<256x128xbf16>
    %cst_32 = arith.constant dense<0.000000e+00> : vector<8x128xf32>
    %32 = tpu.matmul %29, %31, %cst_32 {dimension_numbers = #tpu.dot_dimension_numbers<[1], [0], [0], [1], [0, 0, 1, 1], [], []>} : vector<8x256xbf16>, vector<256x128xbf16>, vector<8x128xf32> -> vector<8x128xf32>
    %c1_33 = arith.constant 1 : index
    %c0_34 = arith.constant 0 : index
    %c0_35 = arith.constant 0 : index
    %33 = vector.load %arg4[%c1_33, %c0_34, %c0_35] : memref<2x1x128xf32, #tpu.memory_space<vmem>>, vector<1x1x128xf32>
    %34 = vector.shape_cast %33 : vector<1x1x128xf32> to vector<1x128xf32>
    %35 = vector.broadcast %34 : vector<1x128xf32> to vector<8x128xf32>
    %36 = arith.addf %32, %35 : vector<8x128xf32>
    %37 = math.tanh %36 : vector<8x128xf32>
    %38 = vector.extract_strided_slice %37 {offsets = [0, 0], sizes = [8, 64], strides = [1, 1]} : vector<8x128xf32> to vector<8x64xf32>
    %39 = arith.truncf %38 : vector<8x64xf32> to vector<8x64xbf16>
    %c1_36 = arith.constant 1 : index
    %c0_37 = arith.constant 0 : index
    %c0_38 = arith.constant 0 : index
    %40 = vector.load %arg8[%c1_36, %c0_37, %c0_38] : memref<2x8x64xbf16, #tpu.memory_space<vmem>>, vector<1x8x64xbf16>
    %41 = vector.shape_cast %40 : vector<1x8x64xbf16> to vector<8x64xbf16>
    %42 = vector.shape_cast %39 : vector<8x64xbf16> to vector<1x8x64xbf16>
    tpu.vector_store %arg8[%c1_36, %c0_37, %c0_38], %42 {strides = array<i32>} : memref<2x8x64xbf16, #tpu.memory_space<vmem>>, vector<1x8x64xbf16>,
    %43 = arith.truncf %37 : vector<8x128xf32> to vector<8x128xbf16>
    %c0_39 = arith.constant 0 : index
    %c0_40 = arith.constant 0 : index
    %44 = vector.load %arg9[%c0_39, %c0_40] : memref<8x256xbf16, #tpu.memory_space<vmem>>, vector<8x128xbf16>
    tpu.vector_store %arg9[%c0_39, %c0_40], %43 {strides = array<i32>} : memref<8x256xbf16, #tpu.memory_space<vmem>>, vector<8x128xbf16>,
    %c0_41 = arith.constant 0 : index
    %c0_42 = arith.constant 0 : index
    %45 = vector.load %arg9[%c0_41, %c0_42] : memref<8x256xbf16, #tpu.memory_space<vmem>>, vector<8x128xbf16>
    %c0_43 = arith.constant 0 : index
    %c0_44 = arith.constant 0 : index
    %46 = vector.load %arg5[%c0_43, %c0_44] : memref<128x32xbf16, #tpu.memory_space<vmem>>, vector<128x32xbf16>
    %cst_45 = arith.constant dense<0.000000e+00> : vector<8x32xf32>
    %47 = tpu.matmul %45, %46, %cst_45 {dimension_numbers = #tpu.dot_dimension_numbers<[1], [0], [0], [1], [0, 0, 1, 1], [], []>} : vector<8x128xbf16>, vector<128x32xbf16>, vector<8x32xf32> -> vector<8x32xf32>
    %c0_46 = arith.constant 0 : index
    %c0_47 = arith.constant 0 : index
    %48 = vector.load %arg6[%c0_46, %c0_47] : memref<1x32xf32, #tpu.memory_space<vmem>>, vector<1x32xf32>
    %49 = vector.broadcast %48 : vector<1x32xf32> to vector<8x32xf32>
    %50 = arith.addf %47, %49 : vector<8x32xf32>
    %c0_48 = arith.constant 0 : index
    %c0_49 = arith.constant 0 : index
    %51 = vector.load %arg7[%c0_48, %c0_49] : memref<8x32xf32, #tpu.memory_space<vmem>>, vector<8x32xf32>
    tpu.vector_store %arg7[%c0_48, %c0_49], %50 {strides = array<i32>} : memref<8x32xf32, #tpu.memory_space<vmem>>, vector<8x32xf32>,
    return
  }
  func.func @transform_0(%arg0: i32) -> (i32, i32) {
    %c0_i32 = arith.constant 0 : i32
    %c0_i32_0 = arith.constant 0 : i32
    return %arg0, %c0_i32 : i32, i32
  }
  func.func @transform_1(%arg0: i32) -> (i32, i32, i32) {
    %c0_i32 = arith.constant 0 : i32
    %c0_i32_0 = arith.constant 0 : i32
    %c0_i32_1 = arith.constant 0 : i32
    return %c0_i32, %arg0, %c0_i32_0 : i32, i32, i32
  }
  func.func @transform_2(%arg0: i32) -> (i32, i32, i32) {
    %c0_i32 = arith.constant 0 : i32
    %c0_i32_0 = arith.constant 0 : i32
    %c0_i32_1 = arith.constant 0 : i32
    %c0_i32_2 = arith.constant 0 : i32
    return %c0_i32, %c0_i32_0, %c0_i32_1 : i32, i32, i32
  }
  func.func @transform_3(%arg0: i32) -> (i32, i32, i32) {
    %c0_i32 = arith.constant 0 : i32
    %c0_i32_0 = arith.constant 0 : i32
    %c0_i32_1 = arith.constant 0 : i32
    %c0_i32_2 = arith.constant 0 : i32
    return %c0_i32, %c0_i32_0, %c0_i32_1 : i32, i32, i32
  }
  func.func @transform_4(%arg0: i32) -> (i32, i32) {
    %c0_i32 = arith.constant 0 : i32
    %c0_i32_0 = arith.constant 0 : i32
    %c0_i32_1 = arith.constant 0 : i32
    return %c0_i32, %c0_i32_0 : i32, i32
  }
  func.func @transform_5(%arg0: i32) -> (i32, i32) {
    %c0_i32 = arith.constant 0 : i32
    %c0_i32_0 = arith.constant 0 : i32
    %c0_i32_1 = arith.constant 0 : i32
    return %c0_i32, %c0_i32_0 : i32, i32
  }
  func.func @transform_6(%arg0: i32) -> (i32, i32) {
    %c0_i32 = arith.constant 0 : i32
    %c0_i32_0 = arith.constant 0 : i32
    return %arg0, %c0_i32 : i32, i32
  }
  func.func @transform_7(%arg0: i32) -> (i32, i32, i32) {
    %c0_i32 = arith.constant 0 : i32
    %c0_i32_0 = arith.constant 0 : i32
    %c0_i32_1 = arith.constant 0 : i32
    return %c0_i32, %arg0, %c0_i32_0 : i32, i32, i32
  }
}

</mosaic_0001>

<bundles_post_ra>
// kernel: tpu_custom_call.1
= control target key start
LH: loop header
LB: loop body
LE: loop exit
PB: predicated region body
PF: predicated region fallthrough
CT: control target
= control target key end

     0   :  { %13 = vsyncpa [#allocation4], 0  ;;  %s929_s0 = inlined_call_operand.vmem [shape: f32[8,32], index: 0, kind: input, shape index: {}]   ;;  %s930_s1 = inlined_call_operand.vmem [shape: f32[2,8,64], index: 1, kind: input, shape index: {}]   ;;  %s931_s2 = inlined_call_operand.hbm [shape: bf16[2,256,128], index: 2, kind: input, shape index: {}]   ;;  %s932_s3 = inlined_call_operand.vmem [shape: f32[2,1,128], index: 3, kind: input, shape index: {}]   ;;  %s933_s4 = inlined_call_operand.vmem [shape: bf16[128,32], index: 4, kind: input, shape index: {}]   ;;  %s934_s5 = inlined_call_operand.vmem [shape: f32[1,32], index: 5, kind: input, shape index: {}]   ;;  %s935_s6 = inlined_call_operand.hbm [shape: f32[8,32], index: 6, kind: output, shape index: {0}]   ;;  %s936_s7 = inlined_call_operand.hbm [shape: bf16[2,8,64], index: 7, kind: output, shape index: {1}]  }
   0x1   :  { %14 = vsyncpa [#allocation5], 0 }
   0x2   :  { %15 = vsyncpa [#allocation8], 0  ;;  %s820_s24 = smov [#allocation3]  }
   0x3   :  { %s25_s25 = sshll.u32 %s820_s24, 4  ;;  %s26_s25 = int_to_ptr.vmem [resolvable:$true] %s25_s25 }
   0x4   :  { %s762_s26 = scalar_lea.vmem %s26_s25, 4096  ;;  %p767_p1 = scmp.lt.s32.totalorder %s26_s25, %s26_s25 }
   0x5   :  { %p763_p0 = scmp.ne.s32.totalorder %s26_s25, %s762_s26  ;;  %p768_p2 = scmp.lt.s32.totalorder %s762_s26, %s762_s26 }
   0x7   :  { %p769_p3 = por %p768_p2, %p767_p1 }
   0x9   :  { %p770_p4 = pnand %p769_p3, %p763_p0 }
   0xb   :  { %773 = shalt.err (!%p770_p4)
}
   0xc   :  { %s821_s27 = smov 64   ;;  %s822_s28 = smov 4  }
   0xd   :  { %31 = dma.hbm_to_vmem [thread:$0]  %s931_s2, 4096, %s26_s25, [#allocation4], %s821_s27, %s821_s27, %s822_s28  }
   0xe   :  { %814 = dma.done.wait [#allocation4], 4096  }
   0xf   :  { %815 = vsyncadd [#allocation4], 4294963200  ;;  %v823_v0 = vmov 0   ;;  %v707_v1 = vld [vmem:[#allocation3 + $0x78] sm:$0xff]   ;;  %v709_v3 = vld [vmem:[#allocation3 + $0x70] sm:$0xff]   ;;  %vm45_vm0 = vcmask 257024  }
  0x10   :  { %42 = vst [vmem:[#allocation2] sm:$0xff] %v823_v0  ;;  %v708_v2 = vld [vmem:[#allocation3 + $0x38] sm:$0xff]   ;;  %626 = vmatprep.subr.bf16.mxu0 %v707_v1  ;;  %v710_v4 = vld [vmem:[#allocation3 + $0x30] sm:$0xff]   ;;  %v711_v5 = vld [vmem:[#allocation3 + $0x68] sm:$0xff]   ;;  %vm49_vm1 = vcmask 519168   ;;  %v824_v42 = vmov 0.0  }
  0x11   :  { %627 = vmatpush3.bf16.msra.mxu0 %v708_v2  ;;  %v712_v6 = vld [vmem:[#allocation3 + $0x28] sm:$0xff]   ;;  %v713_v7 = vld [vmem:[#allocation3 + $0x60] sm:$0xff]   ;;  %v715_v9 = vld [vmem:[#allocation3 + $0x58] sm:$0xff]   ;;  %vm825_vm2 = vmmov 0  }
  0x12   :  { %628 = vmatprep.subr.bf16.mxu0 %v709_v3  ;;  %v714_v8 = vld [vmem:[#allocation3 + $0x20] sm:$0xff]   ;;  %v716_v10 = vld [vmem:[#allocation3 + $0x18] sm:$0xff]   ;;  %v717_v11 = vld [vmem:[#allocation3 + $0x50] sm:$0xff]  }
  0x13   :  { %v43_v12 = vld [vmem:[%s929_s0] sm:$0xff]  ;;  %v718_v14 = vld [vmem:[#allocation3 + $0x10] sm:$0xff]   ;;  %v719_v17 = vld [vmem:[#allocation3 + $0x48] sm:$0xff]  }
  0x14   :  { %v47_v13 = vld [vmem:[%s930_s1] sm:$0xff]  ;;  %v44_v15 = vpack.c.bf16 %v43_v12, %v43_v12  ;;  %v596_v18 = vld [vmem:[%s930_s1 + $0x8] sm:$0xff]  ;;  %v720_v19 = vld [vmem:[#allocation3 + $0x8] sm:$0xff]  }
  0x15   :  { %629 = vmatpush3.bf16.msra.mxu0 %v710_v4  ;;  %v48_v16 = vpack.c.bf16 %v47_v13, %v47_v13  ;;  %v721_v20 = vld [vmem:[#allocation3 + $0x40] sm:$0xff]   ;;  %v240_v21 = vpack.c.bf16 %v596_v18, %v596_v18  ;;  %v724_v26 = vld [vmem:[#allocation3 + $0xf8] sm:$0xff]   ;;  %v726_v28 = vld [vmem:[#allocation3 + $0xf0] sm:$0xff]  }
  0x16   :  { %630 = vmatprep.subr.bf16.mxu0 %v711_v5  ;;  %46 = vst.msk [vmem:[#allocation2] sm:$0xf] %vm45_vm0, %v44_v15  ;;  %v722_v22 = vld [vmem:[#allocation3] sm:$0xff]   ;;  %v725_v27 = vld [vmem:[#allocation3 + $0xb8] sm:$0xff]   ;;  %648 = vmatprep.subr.bf16.mxu1 %v724_v26  ;;  %v727_v29 = vld [vmem:[#allocation3 + $0xb0] sm:$0xff]  }
  0x17   :  { %50 = vst.msk [vmem:[#allocation2 + $0x4] sm:$0xf] %vm49_vm1, %v48_v16  ;;  %649 = vmatpush3.bf16.msra.mxu1 %v725_v27  ;;  %v728_v30 = vld [vmem:[#allocation3 + $0xe8] sm:$0xff]   ;;  %v730_v32 = vld [vmem:[#allocation3 + $0xe0] sm:$0xff]   ;;  %v732_v34 = vld [vmem:[#allocation3 + $0xd8] sm:$0xff]  }
  0x18   :  { %650 = vmatprep.subr.bf16.mxu1 %v726_v28  ;;  %v729_v31 = vld [vmem:[#allocation3 + $0xa8] sm:$0xff]   ;;  %v731_v33 = vld [vmem:[#allocation3 + $0xa0] sm:$0xff]   ;;  %v733_v35 = vld [vmem:[#allocation3 + $0x98] sm:$0xff]  }
  0x19   :  { %631 = vmatpush3.bf16.msra.mxu0 %v712_v6  ;;  %v734_v36 = vld [vmem:[#allocation3 + $0xd0] sm:$0xff]   ;;  %v736_v38 = vld [vmem:[#allocation3 + $0xc8] sm:$0xff]   ;;  %v738_v40 = vld [vmem:[#allocation3 + $0xc0] sm:$0xff]  }
  0x1a   :  { %632 = vmatprep.subr.bf16.mxu0 %v713_v7  ;;  %v735_v37 = vld [vmem:[#allocation3 + $0x90] sm:$0xff]   ;;  %v737_v39 = vld [vmem:[#allocation3 + $0x88] sm:$0xff]   ;;  %v739_v41 = vld [vmem:[#allocation3 + $0x80] sm:$0xff]  }
  0x1b   :  { %651 = vmatpush3.bf16.msra.mxu1 %v727_v29  ;;  %v577_v44 = vld [vmem:[%s932_s3] ss:$0 sm:$0xff]  ;;  %v742_v55 = vld [vmem:[%s933_s4 + $0x38] sm:$0xff]   ;;  %v743_v56 = vld [vmem:[%s933_s4 + $0x30] sm:$0xff]  }
  0x1c   :  { %652 = vmatprep.subr.bf16.mxu1 %v728_v30  ;;  %v744_v57 = vld [vmem:[%s933_s4 + $0x28] sm:$0xff]   ;;  %v745_v58 = vld [vmem:[%s933_s4 + $0x20] sm:$0xff]   ;;  %v746_v59 = vld [vmem:[%s933_s4 + $0x18] sm:$0xff]  }
  0x1d   :  { %633 = vmatpush3.bf16.msra.mxu0 %v714_v8  ;;  %v747_v60 = vld [vmem:[%s933_s4 + $0x10] sm:$0xff]   ;;  %v748_v61 = vld [vmem:[%s933_s4 + $0x8] sm:$0xff]   ;;  %v749_v62 = vld [vmem:[%s933_s4] sm:$0xff]   ;;  %s826_s4 = smov [#allocation7]  }
  0x1e   :  { %634 = vmatprep.subr.bf16.mxu0 %v715_v9  ;;  %v51_v23 = vld [vmem:[#allocation2] sm:$0xff]  ;;  %s561_s9 = sshll.u32 %s826_s4, 4  ;;  %s562_s9 = int_to_ptr.vmem [resolvable:$true] %s561_s9 }
  0x1f   :  { %v579_v24 = vcombine.high %v51_v23, %v51_v23  ;;  %241 = vst.msk [vmem:[#allocation2 + $0x4] sm:$0xf] %vm49_vm1, %v240_v21  ;;  %v578_v25 = vcombine.low %v51_v23, %v51_v23  ;;  %653 = vmatpush3.bf16.msra.mxu1 %v729_v31  ;;  %v598_v0 = vld [vmem:[%s932_s3 + $0x1] ss:$0 sm:$0xff]  ;;  %s774_s10 = scalar_lea.vmem %s562_s9, 128  ;;  %p779_p6 = scmp.lt.s32.totalorder %s562_s9, %s562_s9 }
  0x20   :  { %654 = vmatprep.subr.bf16.mxu1 %v730_v32  ;;  %p775_p5 = scmp.ne.s32.totalorder %s562_s9, %s774_s10  ;;  %p780_p7 = scmp.lt.s32.totalorder %s774_s10, %s774_s10 }
  0x21   :  { %635 = vmatpush3.bf16.msra.mxu0 %v716_v10  ;;  %226 = vmatprep.mubr.bf16.mxu0 %v579_v24 }
  0x22   :  { %636 = vmatprep.subr.bf16.mxu0 %v717_v11  ;;  %p781_p8 = por %p780_p7, %p779_p6 }
  0x23   :  { %655 = vmatpush3.bf16.msra.mxu1 %v731_v33 }
  0x24   :  { %656 = vmatprep.subr.bf16.mxu1 %v732_v34  ;;  %p782_p9 = pnand %p781_p8, %p775_p5 }
  0x25   :  { %637 = vmatpush3.bf16.msra.mxu0 %v718_v14 }
  0x26   :  { %638 = vmatprep.subr.bf16.mxu0 %v719_v17 }
  0x27   :  { %657 = vmatpush3.bf16.msra.mxu1 %v733_v35 }
  0x28   :  { %658 = vmatprep.subr.bf16.mxu1 %v734_v36 }
  0x29   :  { %639 = vmatpush3.bf16.msra.mxu0 %v720_v19 }
  0x2a   :  { %640 = vmatprep.subr.bf16.mxu0 %v721_v20 }
  0x2b   :  { %659 = vmatpush3.bf16.msra.mxu1 %v735_v37 }
  0x2c   :  { %660 = vmatprep.subr.bf16.mxu1 %v736_v38 }
  0x2d   :  { %641 = vmatpush3.bf16.msra.mxu0 %v722_v22 }
  0x2e   :  { %679 = vmatprep.subr.bf16.mxu0 %v824_v42 }
  0x2f   :  { %661 = vmatpush3.bf16.msra.mxu1 %v737_v39 }
  0x30   :  { %227 = vmatmul.mubr.bf16.vlgmr.msra.gmra.mxu0 %v578_v25  ;;  %662 = vmatprep.subr.bf16.mxu1 %v738_v40 }
  0x31   :  { %680 = vmatpush3.bf16.msra.mxu0 %v742_v55  ;;  %695 = vmatprep.mubr.msk.bf16.mxu0 %vm825_vm2, %v824_v42 }
  0x32   :  { %681 = vmatprep.subr.bf16.mxu0 %v824_v42 }
  0x33   :  { %663 = vmatpush3.bf16.msra.mxu1 %v739_v41 }
  0x35   :  { %682 = vmatpush3.bf16.msra.mxu0 %v743_v56 }
  0x36   :  { %683 = vmatprep.subr.bf16.mxu0 %v824_v42 }
  0x39   :  { %684 = vmatpush3.bf16.msra.mxu0 %v744_v57 }
  0x3a   :  { %685 = vmatprep.subr.bf16.mxu0 %v824_v42 }
  0x3d   :  { %686 = vmatpush3.bf16.msra.mxu0 %v745_v58 }
  0x3e   :  { %687 = vmatprep.subr.bf16.mxu0 %v824_v42 }
  0x41   :  { %688 = vmatpush3.bf16.msra.mxu0 %v746_v59 }
  0x42   :  { %689 = vmatprep.subr.bf16.mxu0 %v824_v42 }
  0x45   :  { %690 = vmatpush3.bf16.msra.mxu0 %v747_v60 }
  0x46   :  { %691 = vmatprep.subr.bf16.mxu0 %v824_v42 }
  0x49   :  { %692 = vmatpush3.bf16.msra.mxu0 %v748_v61 }
  0x4a   :  { %693 = vmatprep.subr.bf16.mxu0 %v824_v42 }
  0x4d   :  { %694 = vmatpush3.bf16.msra.mxu0 %v749_v62 }
  0xf0   :  { %v642_v43 = vpop.f32.mrf.mxu0 }
  0xf2   :  { %v643_v45 = vpop.f32.mrf.mxu0 }
  0xf3   :  { %v644_v46 = vadd.f32 %v643_v45, %v642_v43 }
  0xf4   :  { %v645_v47 = vpop.f32.mrf.mxu0 }
  0xf5   :  { %v229_v48 = vadd.f32 %v644_v46, %v577_v44 }
  0xf6   :  { %v646_v49 = vpop.f32.mrf.mxu0 }
  0xf7   :  { %750 = vtanh.f32 %v229_v48 }
 0x104   :  { %v751_v50 = vpop.eup %750 }
 0x105   :  { %v235_v51 = vpack.c.bf16 %v751_v50, %v751_v50 }
 0x107   :  { %237 = vst [vmem:[#allocation2] sm:$0xf] %v235_v51  ;;  %236 = vst.msk [vmem:[#allocation7] sm:$0xf] %vm49_vm1, %v235_v51 }
 0x10e   :  { %v242_v52 = vld [vmem:[#allocation2] sm:$0xff] }
 0x10f   :  { %v600_v53 = vcombine.high %v242_v52, %v242_v52  ;;  %v599_v54 = vcombine.low %v242_v52, %v242_v52 }
 0x111   :  { %419 = vmatprep.mubr.bf16.mxu1 %v600_v53 }
 0x112   :  { %420 = vmatmul.mubr.bf16.vlgmr.msra.gmra.mxu1 %v599_v54 }
 0x1d2   :  { %v664_v63 = vpop.f32.mrf.mxu1 }
 0x1d4   :  { %v665_v1 = vpop.f32.mrf.mxu1 }
 0x1d5   :  { %v666_v2 = vadd.f32 %v665_v1, %v664_v63 }
 0x1d6   :  { %v667_v3 = vpop.f32.mrf.mxu1 }
 0x1d7   :  { %v422_v4 = vadd.f32 %v666_v2, %v598_v0 }
 0x1d8   :  { %v668_v5 = vpop.f32.mrf.mxu1 }
 0x1d9   :  { %752 = vtanh.f32 %v422_v4 }
 0x1e6   :  { %v753_v6 = vpop.eup %752 }
 0x1e7   :  { %v428_v7 = vpack.c.bf16 %v753_v6, %v753_v6 }
 0x1e9   :  { %431 = vst [vmem:[#allocation2] sm:$0xf] %v428_v7  ;;  %430 = vst.msk [vmem:[#allocation7 + $0x4] sm:$0xf] %vm49_vm1, %v428_v7 }
 0x1f0   :  { %v432_v8 = vld [vmem:[#allocation2] sm:$0xf] }
 0x1f1   :  { %696 = vmatmul.mubr.bf16.vlgmr.msra.gmra.mxu0 %v432_v8 }
 0x1f2   :  { %785 = shalt.err (!%p782_p9)
}
 0x1f3   :  { %567 = dma.vmem_to_hbm [thread:$0]  %s562_s9, 128, %s936_s7, [#allocation8], %s821_s27, %s821_s27, %s822_s28   ;;  %vm544_vm3 = vcmask 261120  }
 0x1f4   :  { %v617_v9 = vld [vmem:[%s934_s5] ss:$0 sm:$0xff]  ;;  %s827_s1 = smov [#allocation6]  }
 0x1f5   :  { %s552_s13 = sshll.u32 %s827_s1, 4  ;;  %s553_s13 = int_to_ptr.vmem [resolvable:$true] %s552_s13 }
 0x1f6   :  { %s794_s14 = scalar_lea.vmem %s553_s13, 128  ;;  %p799_p11 = scmp.lt.s32.totalorder %s553_s13, %s553_s13 }
 0x1f7   :  { %p795_p10 = scmp.ne.s32.totalorder %s553_s13, %s794_s14  ;;  %p800_p12 = scmp.lt.s32.totalorder %s794_s14, %s794_s14 }
 0x1f9   :  { %p801_p13 = por %p800_p12, %p799_p11 }
 0x1fb   :  { %p802_p0 = pnand %p801_p13, %p795_p10 }
 0x2b1   :  { %v538_v10 = vpop.f32.mrf.mxu0 }
 0x2b2   :  { %v539_v11 = vadd.f32 %v617_v9, %v538_v10 }
 0x2b3   :  { %v697_v12 = vpop.f32.mrf.mxu0 }
 0x2b4   :  { %545 = vst.msk [vmem:[#allocation6] sm:$0xff] %vm544_vm3, %v539_v11 }
 0x2b5   :  { %v541_v13 = vpop.f32.mrf.mxu0 }
 0x2b6   :  { %805 = shalt.err (!%p802_p0)
}
 0x2b7   :  { %555 = dma.vmem_to_hbm [thread:$0]  %s553_s13, 128, %s935_s6, [#allocation5]   ;;  %v698_v14 = vpop.f32.mrf.mxu0 }
 0x2b8   :  { %816 = dma.done.wait [#allocation5], 128  }
 0x2b9   :  { %817 = vsyncadd [#allocation5], 4294967168 }
 0x2ba   :  { %818 = dma.done.wait [#allocation8], 128  }
 0x2bb   :  { %819 = vsyncadd [#allocation8], 4294967168 }
 0x2bc   :  { %574 = vsyncpa [#allocation4], 1 }
 0x2bd   :  { %575 = vsyncpa [#allocation5], 1 }
 0x2be   :  { %576 = vsyncpa [#allocation8], 1 }

</bundles_post_ra>
